<compile_context>
chip_gen: v5e
topology: v5e:2x2
jax: 0.10.0
libtpu: 0.0.40
codegen_flags: <defaults>
</compile_context>

<pallas_src>
import functools

import jax
import jax.numpy as jnp
from jax.experimental import pallas as pl
from jax.experimental.pallas import tpu as pltpu


def _round_up(n, m):
    return ((n + m - 1) // m) * m


def _cdiv(a, b):
    return (a + b - 1) // b


# ---------------------------------------------------------------------------
# Packed kernel: P = 128 // D logical rows per 128-lane row. Both layers are
# plain NN matmuls against block-diagonal resident weights.
# ---------------------------------------------------------------------------
def _mlp_kernel_packed(x_ref, w1_ref, b1_ref, w2_ref, b2_ref, o_ref, *, scale, offset):
    # x_ref : [TMp, 128]  bf16 (pipelined tile; P logical rows packed per row)
    # w1_ref: [128, P*H]  bf16 (resident block-diagonal W1)
    # b1_ref: [1, P*H]    f32  (resident, b1 tiled P times)
    # w2_ref: [P*H, P]    f32  (resident block-diagonal W2)
    # b2_ref: [1, 1]      f32  (SMEM scalar)
    # o_ref : [TMp, P]    f32
    h = jnp.dot(x_ref[...], w1_ref[...], preferred_element_type=jnp.float32)
    h = jnp.maximum(h + b1_ref[...], 0.0)
    y = jnp.dot(h, w2_ref[...], preferred_element_type=jnp.float32)
    # (y + b2) * (max - min) + min  ==  y * scale + (b2 * scale + offset)
    o_ref[...] = y * scale + (b2_ref[0, 0] * scale + offset)


# ---------------------------------------------------------------------------
# Fallback kernel (D does not divide 128): lane-dense [1, TM] output via an
# NT contraction of the shared H axis.
# ---------------------------------------------------------------------------
def _mlp_kernel_rowmajor(x_ref, w1_ref, b1_ref, w2t_ref, b2_ref, o_ref, *, scale, offset):
    # x_ref : [TM, D] bf16,  w1_ref: [D, H] bf16,  b1_ref: [1, H] f32,
    # w2t_ref: [1, H] f32,   b2_ref: [1, 1] f32 (SMEM),  o_ref: [1, TM] f32
    h = jnp.dot(x_ref[...], w1_ref[...], preferred_element_type=jnp.float32)
    h = jnp.maximum(h + b1_ref[...], 0.0)
    yt = jax.lax.dot_general(
        w2t_ref[...], h,
        dimension_numbers=(((1,), (1,)), ((), ())),
        preferred_element_type=jnp.float32,
    )                                                        # [1, TM]
    o_ref[...] = yt * scale + (b2_ref[0, 0] * scale + offset)


def _forward_packed(x, w1, b1, w2, b2, scale, offset, block_rows):
    B, D = x.shape
    H = w1.shape[1]
    P = 128 // D
    SUB = 16  # sublane multiple (native bf16 tile is (16, 128))

    x_bf16 = x.astype(jnp.bfloat16)
    eye = jnp.eye(P, dtype=jnp.float32)
    w1p = jnp.kron(eye, w1.astype(jnp.float32)).astype(jnp.bfloat16)  # [128, P*H]
    b1p = jnp.tile(b1, (1, P))                                        # [1, P*H]
    w2p = jnp.kron(eye, w2)                                           # [P*H, P]

    # Packed-row tiling: pick the biggest tile (up to block_rows logical rows),
    # then force >= 2 grid steps when the batch is big enough (v7x megacore).
    n_rows = _round_up(_cdiv(B, P), SUB)
    tm = min(max(SUB, block_rows // P), n_rows)
    tm = _round_up(tm, SUB)
    if n_rows >= 2 * SUB and _cdiv(n_rows, tm) < 2:
        tm = _round_up(_cdiv(n_rows, 2), SUB)
    n_rows = _round_up(n_rows, tm)
    grid = (n_rows // tm,)

    b_pad = n_rows * P
    if b_pad != B:
        x_bf16 = jnp.pad(x_bf16, ((0, b_pad - B), (0, 0)))
    xp = x_bf16.reshape(n_rows, P * D)  # contiguous pack: P logical rows per row

    kernel = functools.partial(_mlp_kernel_packed, scale=scale, offset=offset)
    flops = int(2 * n_rows * (P * D) * (P * H) + 2 * n_rows * (P * H) * P)
    bytes_accessed = int(xp.size * 2 + n_rows * P * 4 + w1p.size * 2
                         + b1p.size * 4 + w2p.size * 4 + 4)

    out = pl.pallas_call(
        kernel,
        out_shape=jax.ShapeDtypeStruct((n_rows, P), jnp.float32),
        grid=grid,
        in_specs=[
            pl.BlockSpec((tm, P * D), lambda i: (i, 0)),          # x tile (pipelined)
            pl.BlockSpec((P * D, P * H), lambda i: (0, 0)),       # W1 block-diag (resident)
            pl.BlockSpec((1, P * H), lambda i: (0, 0)),           # b1 (resident)
            pl.BlockSpec((P * H, P), lambda i: (0, 0)),           # W2 block-diag (resident)
            pl.BlockSpec(memory_space=pltpu.MemorySpace.SMEM),    # b2 scalar
        ],
        out_specs=pl.BlockSpec((tm, P), lambda i: (i, 0)),
        compiler_params=pltpu.CompilerParams(
            dimension_semantics=("parallel",),
        ),
        cost_estimate=pl.CostEstimate(
            flops=flops, transcendentals=0, bytes_accessed=bytes_accessed),
    )(xp, w1p, b1p, w2p, b2)

    return out.reshape(-1)[:B].reshape(B, 1)


def _forward_rowmajor(x, w1, b1, w2, b2, scale, offset, block_rows):
    B, D = x.shape
    H = w1.shape[1]
    LANE = 128

    x_bf16 = x.astype(jnp.bfloat16)
    w1_bf16 = w1.astype(jnp.bfloat16)
    w2t = w2.T                                   # [1, H] f32

    b_lane = _round_up(B, LANE)
    tm = min(max(LANE, block_rows), b_lane)
    tm = _round_up(tm, LANE)
    if b_lane >= 2 * LANE and _cdiv(b_lane, tm) < 2:
        tm = _round_up(_cdiv(b_lane, 2), LANE)
    b_pad = _round_up(b_lane, tm)
    if b_pad != B:
        x_bf16 = jnp.pad(x_bf16, ((0, b_pad - B), (0, 0)))
    grid = (b_pad // tm,)

    kernel = functools.partial(_mlp_kernel_rowmajor, scale=scale, offset=offset)
    flops = int(2 * b_pad * D * H + 2 * b_pad * H)
    bytes_accessed = int(x_bf16.size * 2 + b_pad * 4 + w1_bf16.size * 2
                         + b1.size * 4 + w2t.size * 4 + 4)

    out = pl.pallas_call(
        kernel,
        out_shape=jax.ShapeDtypeStruct((1, b_pad), jnp.float32),
        grid=grid,
        in_specs=[
            pl.BlockSpec((tm, D), lambda i: (i, 0)),              # x tile (pipelined)
            pl.BlockSpec((D, H), lambda i: (0, 0)),               # W1 (resident)
            pl.BlockSpec((1, H), lambda i: (0, 0)),               # b1 (resident)
            pl.BlockSpec((1, H), lambda i: (0, 0)),               # W2^T (resident)
            pl.BlockSpec(memory_space=pltpu.MemorySpace.SMEM),    # b2 scalar
        ],
        out_specs=pl.BlockSpec((1, tm), lambda i: (0, i)),        # lane-dense slab
        compiler_params=pltpu.CompilerParams(
            dimension_semantics=("parallel",),
        ),
        cost_estimate=pl.CostEstimate(
            flops=flops, transcendentals=0, bytes_accessed=bytes_accessed),
    )(x_bf16, w1_bf16, b1, w2t, b2)

    return out[0, :B].reshape(B, 1)


def pedestrian_speed_nn(x, w1, b1, w2, b2, *, min_speed=0.0, max_speed=2.0,
                        block_rows=8192):
    """x: [B, D] -> [B, 1] float32 predicted speeds."""
    B, D = x.shape
    H = w1.shape[1]
    scale = float(max_speed) - float(min_speed)
    offset = float(min_speed)

    x = x.astype(jnp.float32)
    w1 = w1.astype(jnp.float32)
    b1 = jnp.reshape(b1, (1, H)).astype(jnp.float32)
    w2 = jnp.reshape(w2, (H, 1)).astype(jnp.float32)
    b2 = jnp.reshape(b2, (1, 1)).astype(jnp.float32)

    if D <= 128 and 128 % D == 0:
        return _forward_packed(x, w1, b1, w2, b2, scale, offset, block_rows)
    return _forward_rowmajor(x, w1, b1, w2, b2, scale, offset, block_rows)


def init_params(key, input_size, hidden_size=8):
    """Deterministic param init mimicking nn.Linear's U(-1/sqrt(fan_in), 1/sqrt(fan_in))."""
    k1, k2, k3, k4 = jax.random.split(key, 4)
    bound1 = 1.0 / jnp.sqrt(jnp.float32(input_size))
    bound2 = 1.0 / jnp.sqrt(jnp.float32(hidden_size))
    w1 = jax.random.uniform(k1, (input_size, hidden_size), jnp.float32, -bound1, bound1)
    b1 = jax.random.uniform(k2, (1, hidden_size), jnp.float32, -bound1, bound1)
    w2 = jax.random.uniform(k3, (hidden_size, 1), jnp.float32, -bound2, bound2)
    b2 = jax.random.uniform(k4, (1, 1), jnp.float32, -bound2, bound2)
    return w1, b1, w2, b2


if __name__ == "__main__":
    key = jax.random.PRNGKey(0)
    kx, kp = jax.random.split(key)

    batch = 2
    input_size = 16
    hidden_size = 8
    min_speed, max_speed = 0.0, 2.0

    x = jax.random.normal(kx, (batch, input_size), jnp.float32)
    w1, b1, w2, b2 = init_params(kp, input_size, hidden_size)

    out = pedestrian_speed_nn(
        x, w1, b1, w2, b2, min_speed=min_speed, max_speed=max_speed
    )
    out = jax.block_until_ready(out)

    # Pure-JAX reference with the same bf16 rounding on the streamed operands
    # (the kernel streams x / W1 in bf16 with f32 accumulation).
    xr = x.astype(jnp.bfloat16).astype(jnp.float32)
    w1r = w1.astype(jnp.bfloat16).astype(jnp.float32)
    h_ref = jnp.maximum(xr @ w1r + b1, 0.0)
    y_ref = (h_ref @ w2 + b2) * (max_speed - min_speed) + min_speed
    assert out.shape == (batch, 1)
    assert jnp.allclose(out, y_ref, atol=1e-4, rtol=1e-4)

    print("KERNEL_OK")
</pallas_src>

<mosaic_0001>
module attributes {stable_mosaic.version = 11 : i64} {
  func.func @_mlp_kernel_packed(%arg0: i32, %arg1: memref<16x128xbf16, #tpu.memory_space<vmem>>, %arg2: memref<128x64xbf16, #tpu.memory_space<vmem>>, %arg3: memref<1x64xf32, #tpu.memory_space<vmem>>, %arg4: memref<64x8xf32, #tpu.memory_space<vmem>>, %arg5: memref<1x1xf32, #tpu.memory_space<smem>>, %arg6: memref<16x8xf32, #tpu.memory_space<vmem>>) attributes {dimension_semantics = [#tpu.dimension_semantics<parallel>], iteration_bounds = array<i64: 1>, scalar_prefetch = 0 : i64, scratch_operands = 0 : i64, tpu.core_type = #tpu.core_type<tc>, window_params = [{transform_indices = @transform_0, window_bounds = array<i64: 16, 128>}, {pipeline_mode = #tpu.pipeline_mode<synchronous>, transform_indices = @transform_1, window_bounds = array<i64: 128, 64>}, {pipeline_mode = #tpu.pipeline_mode<synchronous>, transform_indices = @transform_2, window_bounds = array<i64: 1, 64>}, {pipeline_mode = #tpu.pipeline_mode<synchronous>, transform_indices = @transform_3, window_bounds = array<i64: 64, 8>}, {transform_indices = @transform_4, window_bounds = array<i64: 1, 1>}, {transform_indices = @transform_5, window_bounds = array<i64: 16, 8>}]} {
    %c0 = arith.constant 0 : index
    %c0_0 = arith.constant 0 : index
    %0 = vector.load %arg1[%c0, %c0_0] : memref<16x128xbf16, #tpu.memory_space<vmem>>, vector<16x128xbf16>
    %c0_1 = arith.constant 0 : index
    %c0_2 = arith.constant 0 : index
    %1 = vector.load %arg2[%c0_1, %c0_2] : memref<128x64xbf16, #tpu.memory_space<vmem>>, vector<128x64xbf16>
    %cst = arith.constant dense<0.000000e+00> : vector<16x64xf32>
    %2 = tpu.matmul %0, %1, %cst {dimension_numbers = #tpu.dot_dimension_numbers<[1], [0], [0], [1], [0, 0, 1, 1], [], []>} : vector<16x128xbf16>, vector<128x64xbf16>, vector<16x64xf32> -> vector<16x64xf32>
    %c0_3 = arith.constant 0 : index
    %c0_4 = arith.constant 0 : index
    %3 = vector.load %arg3[%c0_3, %c0_4] : memref<1x64xf32, #tpu.memory_space<vmem>>, vector<1x64xf32>
    %4 = vector.broadcast %3 : vector<1x64xf32> to vector<16x64xf32>
    %5 = arith.addf %2, %4 : vector<16x64xf32>
    %cst_5 = arith.constant 0.000000e+00 : f32
    %6 = vector.broadcast %cst_5 : f32 to vector<16x64xf32>
    %7 = arith.maximumf %5, %6 : vector<16x64xf32>
    %c0_6 = arith.constant 0 : index
    %c0_7 = arith.constant 0 : index
    %8 = vector.load %arg4[%c0_6, %c0_7] : memref<64x8xf32, #tpu.memory_space<vmem>>, vector<64x8xf32>
    %cst_8 = arith.constant dense<0.000000e+00> : vector<16x8xf32>
    %9 = tpu.matmul %7, %8, %cst_8 {dimension_numbers = #tpu.dot_dimension_numbers<[1], [0], [0], [1], [0, 0, 1, 1], [], []>} : vector<16x64xf32>, vector<64x8xf32>, vector<16x8xf32> -> vector<16x8xf32>
    %cst_9 = arith.constant 2.000000e+00 : f32
    %10 = vector.broadcast %cst_9 : f32 to vector<16x8xf32>
    %11 = arith.mulf %9, %10 : vector<16x8xf32>
    %c0_10 = arith.constant 0 : index
    %c0_11 = arith.constant 0 : index
    %12 = memref.load %arg5[%c0_10, %c0_11] : memref<1x1xf32, #tpu.memory_space<smem>>
    %cst_12 = arith.constant 2.000000e+00 : f32
    %13 = arith.mulf %12, %cst_12 : f32
    %cst_13 = arith.constant 0.000000e+00 : f32
    %14 = arith.addf %13, %cst_13 : f32
    %15 = vector.broadcast %14 : f32 to vector<16x8xf32>
    %16 = arith.addf %11, %15 : vector<16x8xf32>
    %c0_14 = arith.constant 0 : index
    %c0_15 = arith.constant 0 : index
    %17 = vector.load %arg6[%c0_14, %c0_15] : memref<16x8xf32, #tpu.memory_space<vmem>>, vector<16x8xf32>
    tpu.vector_store %arg6[%c0_14, %c0_15], %16 {strides = array<i32>} : memref<16x8xf32, #tpu.memory_space<vmem>>, vector<16x8xf32>,
    return
  }
  func.func @transform_0(%arg0: i32) -> (i32, i32) {
    %c0_i32 = arith.constant 0 : i32
    %c0_i32_0 = arith.constant 0 : i32
    return %arg0, %c0_i32 : i32, i32
  }
  func.func @transform_1(%arg0: i32) -> (i32, i32) {
    %c0_i32 = arith.constant 0 : i32
    %c0_i32_0 = arith.constant 0 : i32
    %c0_i32_1 = arith.constant 0 : i32
    return %c0_i32, %c0_i32_0 : i32, i32
  }
  func.func @transform_2(%arg0: i32) -> (i32, i32) {
    %c0_i32 = arith.constant 0 : i32
    %c0_i32_0 = arith.constant 0 : i32
    %c0_i32_1 = arith.constant 0 : i32
    return %c0_i32, %c0_i32_0 : i32, i32
  }
  func.func @transform_3(%arg0: i32) -> (i32, i32) {
    %c0_i32 = arith.constant 0 : i32
    %c0_i32_0 = arith.constant 0 : i32
    %c0_i32_1 = arith.constant 0 : i32
    return %c0_i32, %c0_i32_0 : i32, i32
  }
  func.func @transform_4(%arg0: i32) -> (i32, i32) {
    %c0_i32 = arith.constant 0 : i32
    %c0_i32_0 = arith.constant 0 : i32
    %c0_i32_1 = arith.constant 0 : i32
    return %c0_i32, %c0_i32_0 : i32, i32
  }
  func.func @transform_5(%arg0: i32) -> (i32, i32) {
    %c0_i32 = arith.constant 0 : i32
    %c0_i32_0 = arith.constant 0 : i32
    return %arg0, %c0_i32 : i32, i32
  }
}

</mosaic_0001>

<bundles_post_ra>
// kernel: tpu_custom_call.1
= control target key start
LH: loop header
LB: loop body
LE: loop exit
PB: predicated region body
PF: predicated region fallthrough
CT: control target
= control target key end

     0   :  { %vm121_vm0 = vcmask 523264   ;;  %vm159_vm1 = vcmask 64512   ;;  %s307_s1 = inlined_call_operand.vmem [shape: bf16[128,64], index: 1, kind: input, shape index: {}]   ;;  %s308_s3 = inlined_call_operand.vmem [shape: f32[64,8], index: 3, kind: input, shape index: {}]   ;;  %s309_s2 = inlined_call_operand.vmem [shape: f32[1,64], index: 2, kind: input, shape index: {}]   ;;  %s310_s0 = inlined_call_operand.vmem [shape: bf16[16,128], index: 0, kind: input, shape index: {}]   ;;  %s311_s4 = inlined_call_operand.<no memory space> [shape: f32[1,1], index: 4, kind: input, shape index: {}]   ;;  %s312_s5 = inlined_call_operand.vmem [shape: f32[16,8], index: 5, kind: output, shape index: {}]  }
   0x1   :  { %v212_v0 = vld [vmem:[%s307_s1 + $0x38] sm:$0xff]  ;;  %v211_v1 = vld [vmem:[%s307_s1 + $0x30] sm:$0xff]  ;;  %v118_v4 = vld [vmem:[%s308_s3 + $0x28] sm:$0xff]  ;;  %s154_s29 = smul.f32 2.0, %s311_s4 }
   0x2   :  { %97 = vmatpush.bf16.msra.mxu0 %v212_v0  ;;  %v120_v2 = vld [vmem:[%s308_s3 + $0x38] sm:$0xff]  ;;  %v119_v3 = vld [vmem:[%s308_s3 + $0x30] sm:$0xff]  ;;  %v210_v5 = vld [vmem:[%s307_s1 + $0x28] sm:$0xff] }
   0x3   :  { %136 = vmatpush.msra.mxu1 %v120_v2  ;;  %v117_v6 = vld [vmem:[%s308_s3 + $0x20] sm:$0xff]  ;;  %v116_v7 = vld [vmem:[%s308_s3 + $0x18] sm:$0xff]  ;;  %v207_v10 = vld [vmem:[%s307_s1 + $0x10] sm:$0xff]  ;;  %v156_v25 = vstv %s154_s29 }
   0x4   :  { %v209_v8 = vld [vmem:[%s307_s1 + $0x20] sm:$0xff]  ;;  %v208_v9 = vld [vmem:[%s307_s1 + $0x18] sm:$0xff]  ;;  %v206_v11 = vld [vmem:[%s307_s1 + $0x8] sm:$0xff] }
   0x5   :  { %137 = vmatpush.msra.mxu1 %v119_v3  ;;  %v205_v12 = vld [vmem:[%s307_s1] sm:$0xff]  ;;  %v115_v14 = vld [vmem:[%s308_s3 + $0x10] sm:$0xff]  ;;  %v114_v15 = vld [vmem:[%s308_s3 + $0x8] sm:$0xff] }
   0x6   :  { %98 = vmatpush.bf16.msra.mxu0 %v211_v1  ;;  %v204_v13 = vld [vmem:[%s310_s0] sm:$0xff] }
   0x7   :  { %138 = vmatpush.msra.mxu1 %v118_v4  ;;  %v113_v16 = vld [vmem:[%s308_s3] sm:$0xff] }
   0x8   :  { %v213_v17 = vld [vmem:[%s309_s2] ss:$0 sm:$0xff] }
   0x9   :  { %139 = vmatpush.msra.mxu1 %v117_v6 }
   0xa   :  { %99 = vmatpush.bf16.msra.mxu0 %v210_v5 }
   0xb   :  { %140 = vmatpush.msra.mxu1 %v116_v7 }
   0xd   :  { %141 = vmatpush.msra.mxu1 %v115_v14 }
   0xe   :  { %100 = vmatpush.bf16.msra.mxu0 %v209_v8 }
   0xf   :  { %142 = vmatpush.msra.mxu1 %v114_v15 }
  0x11   :  { %143 = vmatpush.msra.mxu1 %v113_v16 }
  0x12   :  { %101 = vmatpush.bf16.msra.mxu0 %v208_v9 }
  0x16   :  { %102 = vmatpush.bf16.msra.mxu0 %v207_v10 }
  0x1a   :  { %103 = vmatpush.bf16.msra.mxu0 %v206_v11 }
  0x1e   :  { %104 = vmatpush.bf16.msra.mxu0 %v205_v12 }
  0x21   :  { %105 = vmatmul.bf16.vlgmr.msra.gmra.mxu0 %v204_v13 }
  0x9e   :  { %v106_v18 = vpop.f32.mrf.mxu0 }
  0x9f   :  { %v107_v19 = vadd.f32 %v213_v17, %v106_v18 }
  0xa1   :  { %v111_v20 = vmax.f32 %v107_v19, 0.0 }
  0xa3   :  { %202 = vmatmul.msk.f32.vlgmr.msra.gmra.mxu1 %vm121_vm0, %v111_v20 }
  0xa6   :  { %v108_v21 = vpop.f32.mrf.mxu0 }
  0xa7   :  { %v109_v22 = vadd.f32 %v213_v17, %v108_v21 }
  0xa9   :  { %v112_v23 = vmax.f32 %v109_v22, 0.0 }
  0xab   :  { %203 = vmatmul.msk.f32.gmra.mxu1 %vm121_vm0, %v112_v23 }
 0x120   :  { %v145_v24 = vpop.f32.mrf.mxu1 }
 0x121   :  { %v151_v26 = vmul.f32 2.0, %v145_v24 }
 0x123   :  { %v157_v27 = vadd.f32 %v156_v25, %v151_v26 }
 0x125   :  { %160 = vst.msk [vmem:[%s312_s5] sm:$0xff] %vm159_vm1, %v157_v27 }
 0x128   :  { %v148_v28 = vpop.f32.mrf.mxu1 }
 0x129   :  { %v152_v29 = vmul.f32 2.0, %v148_v28 }
 0x12b   :  { %v158_v30 = vadd.f32 %v156_v25, %v152_v29 }
 0x12d   :  { %161 = vst.msk [vmem:[%s312_s5 + $0x8] sm:$0xff] %vm159_vm1, %v158_v30 }

</bundles_post_ra>
